<compile_context>
chip_gen: v7x
topology: tpu7x:2x2x1
jax: 0.10.0
libtpu: 0.0.40
codegen_flags: <defaults>
</compile_context>

<pallas_src>
import functools

import jax
import jax.numpy as jnp
from jax.experimental import pallas as pl
from jax.experimental.pallas import tpu as pltpu


# ----------------------------- Pallas kernels ----------------------------- #

def _mm_bn_kernel(x_ref, w_ref, sc_ref, sh_ref, o_ref, *, relu):
    """(tile of X) @ W on the MXU (bf16 in, f32 acc), then folded-BN
    scale/shift and optional ReLU."""
    acc = jnp.dot(x_ref[...], w_ref[...], preferred_element_type=jnp.float32)
    acc = acc * sc_ref[...] + sh_ref[...]        # (1, N) broadcasts over rows
    if relu:
        acc = jnp.maximum(acc, 0.0)
    o_ref[...] = acc.astype(o_ref.dtype)


def _mm_bn_res_kernel(x_ref, w_ref, sc_ref, sh_ref, r_ref, o_ref):
    """out = relu(X @ W * scale + shift + residual)  (fused block epilogue)."""
    acc = jnp.dot(x_ref[...], w_ref[...], preferred_element_type=jnp.float32)
    acc = acc * sc_ref[...] + sh_ref[...] + r_ref[...]
    o_ref[...] = jnp.maximum(acc, 0.0).astype(o_ref.dtype)


# --------------------------- kernel driver -------------------------------- #

def _round_up(x, m):
    return (x + m - 1) // m * m


def _choose_tm(M, K, N, budget_bytes=24 * 1024 * 1024):
    """Largest M tile whose double-buffered footprint fits the VMEM budget."""
    for tm in (2048, 1024, 512, 256, 128, 64, 32, 16, 8):
        per_step = 2 * (tm * K * 2 + tm * N * 4 + tm * N * 4)   # x(bf16)+out+res
        fixed = 2 * (K * N * 2 + 2 * N * 4)                     # w + scale/shift
        if per_step + fixed <= budget_bytes:
            return min(tm, _round_up(M, 8))
    return 8


def fused_matmul_bn(x, w, scale, shift, residual=None, *, relu=True):
    """y = [relu]((x @ w) * scale + shift [+ residual]).

    x: (M, K) bf16, w: (K, N) bf16, scale/shift: (1, N) f32,
    residual: (M, N) f32 or None.  Returns (M, N) f32.
    Tiles only over M (K, N are full blocks, which satisfies the (8,128) rule
    because a block equal to the full array dim is allowed); M is zero-padded
    to a tile multiple so there is never a single over-sized block.
    """
    M, K = x.shape
    _, N = w.shape
    tm = _choose_tm(M, K, N)
    Mp = _round_up(M, tm)
    if Mp != M:
        x = jnp.pad(x, ((0, Mp - M), (0, 0)))
        if residual is not None:
            residual = jnp.pad(residual, ((0, Mp - M), (0, 0)))
    grid = (Mp // tm,)

    x_spec = pl.BlockSpec((tm, K), lambda i: (i, 0))
    w_spec = pl.BlockSpec((K, N), lambda i: (0, 0))
    v_spec = pl.BlockSpec((1, N), lambda i: (0, 0))
    o_spec = pl.BlockSpec((tm, N), lambda i: (i, 0))

    cparams = pltpu.CompilerParams(
        dimension_semantics=("parallel",),
        vmem_limit_bytes=48 * 1024 * 1024)

    if residual is None:
        out = pl.pallas_call(
            functools.partial(_mm_bn_kernel, relu=relu),
            out_shape=jax.ShapeDtypeStruct((Mp, N), jnp.float32),
            grid_spec=pltpu.PrefetchScalarGridSpec(
                num_scalar_prefetch=0,
                grid=grid,
                in_specs=[x_spec, w_spec, v_spec, v_spec],
                out_specs=o_spec),
            compiler_params=cparams,
        )(x, w, scale, shift)
    else:
        out = pl.pallas_call(
            _mm_bn_res_kernel,
            out_shape=jax.ShapeDtypeStruct((Mp, N), jnp.float32),
            grid_spec=pltpu.PrefetchScalarGridSpec(
                num_scalar_prefetch=0,
                grid=grid,
                in_specs=[x_spec, w_spec, v_spec, v_spec,
                          pl.BlockSpec((tm, N), lambda i: (i, 0))],
                out_specs=o_spec),
            compiler_params=cparams,
        )(x, w, scale, shift, residual)
    return out[:M] if Mp != M else out


# ------------------------------ JAX glue ----------------------------------- #

def _im2col_nhwc(x, kh, kw, stride, pad):
    """x: (N, H, W, C) -> (N*OH*OW, KH*KW*C) patch matrix, (kh, kw, c) order."""
    n, h, w, c = x.shape
    if pad:
        x = jnp.pad(x, ((0, 0), (pad, pad), (pad, pad), (0, 0)))
    oh = (h + 2 * pad - kh) // stride + 1
    ow = (w + 2 * pad - kw) // stride + 1
    if kh == 1 and kw == 1:
        cols = x[:, ::stride, ::stride, :]
        return cols.reshape(n * oh * ow, c), oh, ow
    patches = []
    for i in range(kh):
        for j in range(kw):
            patches.append(x[:, i:i + stride * oh:stride,
                             j:j + stride * ow:stride, :])
    cols = jnp.stack(patches, axis=3)             # (N, OH, OW, KH*KW, C)
    return cols.reshape(n * oh * ow, kh * kw * c), oh, ow


def conv_bn(x_nhwc, layer, *, kh, stride, relu, residual=None):
    """Conv2d(k=kh, stride, pad=kh//2, bias=False) + folded BatchNorm, with
    optional fused residual add and ReLU.  NHWC in / NHWC out."""
    n = x_nhwc.shape[0]
    cols, oh, ow = _im2col_nhwc(x_nhwc, kh, kh, stride, kh // 2)
    res = None if residual is None else residual.reshape(n * oh * ow, -1)
    y = fused_matmul_bn(cols.astype(jnp.bfloat16), layer["w"],
                        layer["scale"], layer["shift"],
                        residual=res, relu=relu)
    return y.reshape(n, oh, ow, -1)


def _fold_bn(w_oihw, gamma, beta, mean, var, eps=1e-5):
    """Conv weight (Cout,Cin,KH,KW) -> MXU layout (KH*KW*Cin, Cout) bf16, plus
    folded inference-mode BN as per-channel f32 scale/shift."""
    cout, cin, kh, kw = w_oihw.shape
    w_mat = jnp.transpose(w_oihw, (2, 3, 1, 0)).reshape(kh * kw * cin, cout)
    scale = gamma / jnp.sqrt(var + eps)
    shift = beta - mean * scale
    return {"w": w_mat.astype(jnp.bfloat16),
            "scale": scale.reshape(1, cout).astype(jnp.float32),
            "shift": shift.reshape(1, cout).astype(jnp.float32)}


def _basic_block_forward(params, x_nchw, *, stride, has_shortcut):
    x = jnp.transpose(x_nchw, (0, 2, 3, 1)).astype(jnp.float32)  # NCHW->NHWC
    # conv1(3x3, stride) + bn1 + relu
    h = conv_bn(x, params["c1"], kh=3, stride=stride, relu=True)
    # shortcut path
    if has_shortcut:
        sc = conv_bn(x, params["sc"], kh=1, stride=stride, relu=False)
    else:
        sc = x
    # conv2(3x3, s=1) + bn2, with residual add + final ReLU fused in-kernel
    out = conv_bn(h, params["c2"], kh=3, stride=1, relu=True, residual=sc)
    return jnp.transpose(out, (0, 3, 1, 2))                      # back to NCHW


class BasicBlockPallas:
    expansion = 1

    def __init__(self, in_planes, planes, stride=1, key=jax.random.PRNGKey(0)):
        self.in_planes = in_planes
        self.planes = planes
        self.stride = stride
        self.has_shortcut = (stride != 1 or in_planes != self.expansion * planes)

        ks = jax.random.split(key, 6)

        def conv_w(k, cout, cin, kh):
            bound = 1.0 / float(cin * kh * kh) ** 0.5
            return jax.random.uniform(k, (cout, cin, kh, kh), jnp.float32,
                                      -bound, bound)

        def bn_params(k, c):
            k1, k2, k3, k4 = jax.random.split(k, 4)
            gamma = jax.random.uniform(k1, (c,), jnp.float32, 0.5, 1.5)
            beta = 0.1 * jax.random.normal(k2, (c,), dtype=jnp.float32)
            mean = 0.1 * jax.random.normal(k3, (c,), dtype=jnp.float32)
            var = jax.random.uniform(k4, (c,), jnp.float32, 0.5, 1.5)
            return gamma, beta, mean, var

        p = {}
        p["c1"] = _fold_bn(conv_w(ks[0], planes, in_planes, 3),
                           *bn_params(ks[1], planes))
        p["c2"] = _fold_bn(conv_w(ks[2], planes, planes, 3),
                           *bn_params(ks[3], planes))
        if self.has_shortcut:
            p["sc"] = _fold_bn(conv_w(ks[4], planes, in_planes, 1),
                               *bn_params(ks[5], planes))
        self.params = p

        self._fwd = jax.jit(functools.partial(
            _basic_block_forward, stride=stride,
            has_shortcut=self.has_shortcut))

    def __call__(self, x_nchw):
        return self._fwd(self.params, x_nchw)


# -------------------------- pure-JAX reference ----------------------------- #

def _ref_forward(params, x_nchw, *, stride, has_shortcut, in_planes, planes):
    def conv(x, layer, kh, cin, stride, relu, residual=None):
        cout = layer["scale"].shape[-1]
        w = layer["w"].reshape(kh, kh, cin, cout)
        y = jax.lax.conv_general_dilated(
            x.astype(jnp.bfloat16), w, (stride, stride),
            [(kh // 2, kh // 2), (kh // 2, kh // 2)],
            dimension_numbers=("NHWC", "HWIO", "NHWC"),
            preferred_element_type=jnp.float32)
        y = y * layer["scale"][0] + layer["shift"][0]
        if residual is not None:
            y = y + residual
        return jnp.maximum(y, 0.0) if relu else y

    x = jnp.transpose(x_nchw, (0, 2, 3, 1)).astype(jnp.float32)
    h = conv(x, params["c1"], 3, in_planes, stride, True)
    sc = (conv(x, params["sc"], 1, in_planes, stride, False)
          if has_shortcut else x)
    out = conv(h, params["c2"], 3, planes, 1, True, residual=sc)
    return jnp.transpose(out, (0, 3, 1, 2))


if __name__ == "__main__":
    key = jax.random.PRNGKey(0)
    kx1, kp1, kx2, kp2 = jax.random.split(key, 4)

    # Config A: projection shortcut (stride=2, channel change).
    x1 = jax.random.normal(kx1, (2, 4, 16, 16), dtype=jnp.float32)
    blk1 = BasicBlockPallas(in_planes=4, planes=8, stride=2, key=kp1)
    y1 = blk1(x1)
    jax.block_until_ready(y1)
    assert y1.shape == (2, 8, 8, 8), y1.shape
    r1 = _ref_forward(blk1.params, x1, stride=2, has_shortcut=True,
                      in_planes=4, planes=8)
    assert jnp.allclose(y1, r1, atol=1e-1, rtol=1e-1), \
        float(jnp.max(jnp.abs(y1 - r1)))

    # Config B: identity shortcut (stride=1, same channels).
    x2 = jax.random.normal(kx2, (2, 8, 16, 16), dtype=jnp.float32)
    blk2 = BasicBlockPallas(in_planes=8, planes=8, stride=1, key=kp2)
    y2 = blk2(x2)
    jax.block_until_ready(y2)
    assert y2.shape == (2, 8, 16, 16), y2.shape
    r2 = _ref_forward(blk2.params, x2, stride=1, has_shortcut=False,
                      in_planes=8, planes=8)
    assert jnp.allclose(y2, r2, atol=1e-1, rtol=1e-1), \
        float(jnp.max(jnp.abs(y2 - r2)))

    print("KERNEL_OK")
</pallas_src>

<mosaic_0001>
module attributes {stable_mosaic.version = 11 : i64} {
  func.func @_mm_bn_kernel(%arg0: i32, %arg1: memref<128x36xbf16, #tpu.memory_space<vmem>>, %arg2: memref<36x8xbf16, #tpu.memory_space<vmem>>, %arg3: memref<1x8xf32, #tpu.memory_space<vmem>>, %arg4: memref<1x8xf32, #tpu.memory_space<vmem>>, %arg5: memref<128x8xf32, #tpu.memory_space<vmem>>) attributes {dimension_semantics = [#tpu.dimension_semantics<parallel>], iteration_bounds = array<i64: 1>, scalar_prefetch = 0 : i64, scratch_operands = 0 : i64, tpu.core_type = #tpu.core_type<tc>, window_params = [{transform_indices = @transform_0, window_bounds = array<i64: 128, 36>}, {pipeline_mode = #tpu.pipeline_mode<synchronous>, transform_indices = @transform_1, window_bounds = array<i64: 36, 8>}, {pipeline_mode = #tpu.pipeline_mode<synchronous>, transform_indices = @transform_2, window_bounds = array<i64: 1, 8>}, {pipeline_mode = #tpu.pipeline_mode<synchronous>, transform_indices = @transform_3, window_bounds = array<i64: 1, 8>}, {transform_indices = @transform_4, window_bounds = array<i64: 128, 8>}]} {
    %c0 = arith.constant 0 : index
    %c0_0 = arith.constant 0 : index
    %0 = vector.load %arg1[%c0, %c0_0] : memref<128x36xbf16, #tpu.memory_space<vmem>>, vector<128x36xbf16>
    %c0_1 = arith.constant 0 : index
    %c0_2 = arith.constant 0 : index
    %1 = vector.load %arg2[%c0_1, %c0_2] : memref<36x8xbf16, #tpu.memory_space<vmem>>, vector<36x8xbf16>
    %cst = arith.constant dense<0.000000e+00> : vector<128x8xf32>
    %2 = tpu.matmul %0, %1, %cst {dimension_numbers = #tpu.dot_dimension_numbers<[1], [0], [0], [1], [0, 0, 1, 1], [], []>} : vector<128x36xbf16>, vector<36x8xbf16>, vector<128x8xf32> -> vector<128x8xf32>
    %c0_3 = arith.constant 0 : index
    %c0_4 = arith.constant 0 : index
    %3 = vector.load %arg3[%c0_3, %c0_4] : memref<1x8xf32, #tpu.memory_space<vmem>>, vector<1x8xf32>
    %4 = vector.broadcast %3 : vector<1x8xf32> to vector<128x8xf32>
    %5 = arith.mulf %2, %4 : vector<128x8xf32>
    %c0_5 = arith.constant 0 : index
    %c0_6 = arith.constant 0 : index
    %6 = vector.load %arg4[%c0_5, %c0_6] : memref<1x8xf32, #tpu.memory_space<vmem>>, vector<1x8xf32>
    %7 = vector.broadcast %6 : vector<1x8xf32> to vector<128x8xf32>
    %8 = arith.addf %5, %7 : vector<128x8xf32>
    %cst_7 = arith.constant 0.000000e+00 : f32
    %9 = vector.broadcast %cst_7 : f32 to vector<128x8xf32>
    %10 = arith.maximumf %8, %9 : vector<128x8xf32>
    %c0_8 = arith.constant 0 : index
    %c0_9 = arith.constant 0 : index
    %11 = vector.load %arg5[%c0_8, %c0_9] : memref<128x8xf32, #tpu.memory_space<vmem>>, vector<128x8xf32>
    tpu.vector_store %arg5[%c0_8, %c0_9], %10 {strides = array<i32>} : memref<128x8xf32, #tpu.memory_space<vmem>>, vector<128x8xf32>,
    return
  }
  func.func @transform_0(%arg0: i32) -> (i32, i32) {
    %c0_i32 = arith.constant 0 : i32
    %c0_i32_0 = arith.constant 0 : i32
    return %arg0, %c0_i32 : i32, i32
  }
  func.func @transform_1(%arg0: i32) -> (i32, i32) {
    %c0_i32 = arith.constant 0 : i32
    %c0_i32_0 = arith.constant 0 : i32
    %c0_i32_1 = arith.constant 0 : i32
    return %c0_i32, %c0_i32_0 : i32, i32
  }
  func.func @transform_2(%arg0: i32) -> (i32, i32) {
    %c0_i32 = arith.constant 0 : i32
    %c0_i32_0 = arith.constant 0 : i32
    %c0_i32_1 = arith.constant 0 : i32
    return %c0_i32, %c0_i32_0 : i32, i32
  }
  func.func @transform_3(%arg0: i32) -> (i32, i32) {
    %c0_i32 = arith.constant 0 : i32
    %c0_i32_0 = arith.constant 0 : i32
    %c0_i32_1 = arith.constant 0 : i32
    return %c0_i32, %c0_i32_0 : i32, i32
  }
  func.func @transform_4(%arg0: i32) -> (i32, i32) {
    %c0_i32 = arith.constant 0 : i32
    %c0_i32_0 = arith.constant 0 : i32
    return %arg0, %c0_i32 : i32, i32
  }
}

module attributes {stable_mosaic.version = 11 : i64} {
  func.func @_mm_bn_kernel(%arg0: i32, %arg1: memref<128x4xbf16, #tpu.memory_space<vmem>>, %arg2: memref<4x8xbf16, #tpu.memory_space<vmem>>, %arg3: memref<1x8xf32, #tpu.memory_space<vmem>>, %arg4: memref<1x8xf32, #tpu.memory_space<vmem>>, %arg5: memref<128x8xf32, #tpu.memory_space<vmem>>) attributes {dimension_semantics = [#tpu.dimension_semantics<parallel>], iteration_bounds = array<i64: 1>, scalar_prefetch = 0 : i64, scratch_operands = 0 : i64, tpu.core_type = #tpu.core_type<tc>, window_params = [{transform_indices = @transform_0, window_bounds = array<i64: 128, 4>}, {pipeline_mode = #tpu.pipeline_mode<synchronous>, transform_indices = @transform_1, window_bounds = array<i64: 4, 8>}, {pipeline_mode = #tpu.pipeline_mode<synchronous>, transform_indices = @transform_2, window_bounds = array<i64: 1, 8>}, {pipeline_mode = #tpu.pipeline_mode<synchronous>, transform_indices = @transform_3, window_bounds = array<i64: 1, 8>}, {transform_indices = @transform_4, window_bounds = array<i64: 128, 8>}]} {
    %c0 = arith.constant 0 : index
    %c0_0 = arith.constant 0 : index
    %0 = vector.load %arg1[%c0, %c0_0] : memref<128x4xbf16, #tpu.memory_space<vmem>>, vector<128x4xbf16>
    %c0_1 = arith.constant 0 : index
    %c0_2 = arith.constant 0 : index
    %1 = vector.load %arg2[%c0_1, %c0_2] : memref<4x8xbf16, #tpu.memory_space<vmem>>, vector<4x8xbf16>
    %cst = arith.constant dense<0.000000e+00> : vector<128x8xf32>
    %2 = tpu.matmul %0, %1, %cst {dimension_numbers = #tpu.dot_dimension_numbers<[1], [0], [0], [1], [0, 0, 1, 1], [], []>} : vector<128x4xbf16>, vector<4x8xbf16>, vector<128x8xf32> -> vector<128x8xf32>
    %c0_3 = arith.constant 0 : index
    %c0_4 = arith.constant 0 : index
    %3 = vector.load %arg3[%c0_3, %c0_4] : memref<1x8xf32, #tpu.memory_space<vmem>>, vector<1x8xf32>
    %4 = vector.broadcast %3 : vector<1x8xf32> to vector<128x8xf32>
    %5 = arith.mulf %2, %4 : vector<128x8xf32>
    %c0_5 = arith.constant 0 : index
    %c0_6 = arith.constant 0 : index
    %6 = vector.load %arg4[%c0_5, %c0_6] : memref<1x8xf32, #tpu.memory_space<vmem>>, vector<1x8xf32>
    %7 = vector.broadcast %6 : vector<1x8xf32> to vector<128x8xf32>
    %8 = arith.addf %5, %7 : vector<128x8xf32>
    %c0_7 = arith.constant 0 : index
    %c0_8 = arith.constant 0 : index
    %9 = vector.load %arg5[%c0_7, %c0_8] : memref<128x8xf32, #tpu.memory_space<vmem>>, vector<128x8xf32>
    tpu.vector_store %arg5[%c0_7, %c0_8], %8 {strides = array<i32>} : memref<128x8xf32, #tpu.memory_space<vmem>>, vector<128x8xf32>,
    return
  }
  func.func @transform_0(%arg0: i32) -> (i32, i32) {
    %c0_i32 = arith.constant 0 : i32
    %c0_i32_0 = arith.constant 0 : i32
    return %arg0, %c0_i32 : i32, i32
  }
  func.func @transform_1(%arg0: i32) -> (i32, i32) {
    %c0_i32 = arith.constant 0 : i32
    %c0_i32_0 = arith.constant 0 : i32
    %c0_i32_1 = arith.constant 0 : i32
    return %c0_i32, %c0_i32_0 : i32, i32
  }
  func.func @transform_2(%arg0: i32) -> (i32, i32) {
    %c0_i32 = arith.constant 0 : i32
    %c0_i32_0 = arith.constant 0 : i32
    %c0_i32_1 = arith.constant 0 : i32
    return %c0_i32, %c0_i32_0 : i32, i32
  }
  func.func @transform_3(%arg0: i32) -> (i32, i32) {
    %c0_i32 = arith.constant 0 : i32
    %c0_i32_0 = arith.constant 0 : i32
    %c0_i32_1 = arith.constant 0 : i32
    return %c0_i32, %c0_i32_0 : i32, i32
  }
  func.func @transform_4(%arg0: i32) -> (i32, i32) {
    %c0_i32 = arith.constant 0 : i32
    %c0_i32_0 = arith.constant 0 : i32
    return %arg0, %c0_i32 : i32, i32
  }
}

module attributes {stable_mosaic.version = 11 : i64} {
  func.func @_mm_bn_res_kernel(%arg0: i32, %arg1: memref<128x72xbf16, #tpu.memory_space<vmem>>, %arg2: memref<72x8xbf16, #tpu.memory_space<vmem>>, %arg3: memref<1x8xf32, #tpu.memory_space<vmem>>, %arg4: memref<1x8xf32, #tpu.memory_space<vmem>>, %arg5: memref<128x8xf32, #tpu.memory_space<vmem>>, %arg6: memref<128x8xf32, #tpu.memory_space<vmem>>) attributes {dimension_semantics = [#tpu.dimension_semantics<parallel>], iteration_bounds = array<i64: 1>, scalar_prefetch = 0 : i64, scratch_operands = 0 : i64, tpu.core_type = #tpu.core_type<tc>, window_params = [{transform_indices = @transform_0, window_bounds = array<i64: 128, 72>}, {pipeline_mode = #tpu.pipeline_mode<synchronous>, transform_indices = @transform_1, window_bounds = array<i64: 72, 8>}, {pipeline_mode = #tpu.pipeline_mode<synchronous>, transform_indices = @transform_2, window_bounds = array<i64: 1, 8>}, {pipeline_mode = #tpu.pipeline_mode<synchronous>, transform_indices = @transform_3, window_bounds = array<i64: 1, 8>}, {transform_indices = @transform_4, window_bounds = array<i64: 128, 8>}, {transform_indices = @transform_5, window_bounds = array<i64: 128, 8>}]} {
    %c0 = arith.constant 0 : index
    %c0_0 = arith.constant 0 : index
    %0 = vector.load %arg1[%c0, %c0_0] : memref<128x72xbf16, #tpu.memory_space<vmem>>, vector<128x72xbf16>
    %c0_1 = arith.constant 0 : index
    %c0_2 = arith.constant 0 : index
    %1 = vector.load %arg2[%c0_1, %c0_2] : memref<72x8xbf16, #tpu.memory_space<vmem>>, vector<72x8xbf16>
    %cst = arith.constant dense<0.000000e+00> : vector<128x8xf32>
    %2 = tpu.matmul %0, %1, %cst {dimension_numbers = #tpu.dot_dimension_numbers<[1], [0], [0], [1], [0, 0, 1, 1], [], []>} : vector<128x72xbf16>, vector<72x8xbf16>, vector<128x8xf32> -> vector<128x8xf32>
    %c0_3 = arith.constant 0 : index
    %c0_4 = arith.constant 0 : index
    %3 = vector.load %arg3[%c0_3, %c0_4] : memref<1x8xf32, #tpu.memory_space<vmem>>, vector<1x8xf32>
    %4 = vector.broadcast %3 : vector<1x8xf32> to vector<128x8xf32>
    %5 = arith.mulf %2, %4 : vector<128x8xf32>
    %c0_5 = arith.constant 0 : index
    %c0_6 = arith.constant 0 : index
    %6 = vector.load %arg4[%c0_5, %c0_6] : memref<1x8xf32, #tpu.memory_space<vmem>>, vector<1x8xf32>
    %7 = vector.broadcast %6 : vector<1x8xf32> to vector<128x8xf32>
    %8 = arith.addf %5, %7 : vector<128x8xf32>
    %c0_7 = arith.constant 0 : index
    %c0_8 = arith.constant 0 : index
    %9 = vector.load %arg5[%c0_7, %c0_8] : memref<128x8xf32, #tpu.memory_space<vmem>>, vector<128x8xf32>
    %10 = arith.addf %8, %9 : vector<128x8xf32>
    %cst_9 = arith.constant 0.000000e+00 : f32
    %11 = vector.broadcast %cst_9 : f32 to vector<128x8xf32>
    %12 = arith.maximumf %10, %11 : vector<128x8xf32>
    %c0_10 = arith.constant 0 : index
    %c0_11 = arith.constant 0 : index
    %13 = vector.load %arg6[%c0_10, %c0_11] : memref<128x8xf32, #tpu.memory_space<vmem>>, vector<128x8xf32>
    tpu.vector_store %arg6[%c0_10, %c0_11], %12 {strides = array<i32>} : memref<128x8xf32, #tpu.memory_space<vmem>>, vector<128x8xf32>,
    return
  }
  func.func @transform_0(%arg0: i32) -> (i32, i32) {
    %c0_i32 = arith.constant 0 : i32
    %c0_i32_0 = arith.constant 0 : i32
    return %arg0, %c0_i32 : i32, i32
  }
  func.func @transform_1(%arg0: i32) -> (i32, i32) {
    %c0_i32 = arith.constant 0 : i32
    %c0_i32_0 = arith.constant 0 : i32
    %c0_i32_1 = arith.constant 0 : i32
    return %c0_i32, %c0_i32_0 : i32, i32
  }
  func.func @transform_2(%arg0: i32) -> (i32, i32) {
    %c0_i32 = arith.constant 0 : i32
    %c0_i32_0 = arith.constant 0 : i32
    %c0_i32_1 = arith.constant 0 : i32
    return %c0_i32, %c0_i32_0 : i32, i32
  }
  func.func @transform_3(%arg0: i32) -> (i32, i32) {
    %c0_i32 = arith.constant 0 : i32
    %c0_i32_0 = arith.constant 0 : i32
    %c0_i32_1 = arith.constant 0 : i32
    return %c0_i32, %c0_i32_0 : i32, i32
  }
  func.func @transform_4(%arg0: i32) -> (i32, i32) {
    %c0_i32 = arith.constant 0 : i32
    %c0_i32_0 = arith.constant 0 : i32
    return %arg0, %c0_i32 : i32, i32
  }
  func.func @transform_5(%arg0: i32) -> (i32, i32) {
    %c0_i32 = arith.constant 0 : i32
    %c0_i32_0 = arith.constant 0 : i32
    return %arg0, %c0_i32 : i32, i32
  }
}

</mosaic_0001>

<bundles_post_ra>
// kernel: _basic_block_forward.3
= control target key start
LH: loop header
LB: loop body
LE: loop exit
PB: predicated region body
PF: predicated region fallthrough
CT: control target
= control target key end

     0   :  { %vm94_vm0 = vcmask 293888   ;;  %vm119_vm1 = vcmask 1041408   ;;  %vm282_vm2 = vcmask 64512   ;;  %s548_s1 = inlined_call_operand.vmem [shape: bf16[36,8], index: 1, kind: input, shape index: {}]   ;;  %s549_s0 = inlined_call_operand.vmem [shape: bf16[128,36], index: 0, kind: input, shape index: {}]   ;;  %s550_s2 = inlined_call_operand.vmem [shape: f32[1,8], index: 2, kind: input, shape index: {}]   ;;  %s551_s3 = inlined_call_operand.vmem [shape: f32[1,8], index: 3, kind: input, shape index: {}]   ;;  %s552_s4 = inlined_call_operand.vmem [shape: f32[128,8], index: 4, kind: output, shape index: {}]  }
   0x1   :  { %v365_v0 = vld [vmem:[%s548_s1] sm:$0xff]   ;;  %v366_v1 = vld [vmem:[%s548_s1 + $0x8] sm:$0xff]   ;;  %v367_v2 = vld [vmem:[%s548_s1 + $0x10] ss:$0 sps:$4 sm:$0x33]  }
   0x2   :  { %335 = vmatprep.subr.bf16.mxu0 %v365_v0  ;;  %357 = vmatprep.subr.bf16.mxu1 %v365_v0  ;;  %v368_v3 = vld [vmem:[%s549_s0] sm:$0xff]   ;;  %v121_v5 = vsel %vm119_vm1, %v367_v2, 0  ;;  %v370_v6 = vld [vmem:[%s549_s0 + $0x8] sm:$0xff]   ;;  %v372_v8 = vld [vmem:[%s549_s0 + $0x10] sm:$0xff]  }
   0x3   :  { %336 = vmatpush3.bf16.msra.mxu0 %v365_v0  ;;  %360 = vmatpush3.bf16.msra.mxu1 %v365_v0  ;;  %v369_v4 = vld [vmem:[%s549_s0 + $0x20] sm:$0xff]   ;;  %v371_v7 = vld [vmem:[%s549_s0 + $0x28] sm:$0xff]   ;;  %v373_v9 = vld [vmem:[%s549_s0 + $0x30] sm:$0xff]  }
   0x4   :  { %337 = vmatprep.subr.bf16.mxu0 %v366_v1  ;;  %358 = vmatprep.subr.bf16.mxu1 %v366_v1  ;;  %v374_v10 = vld [vmem:[%s549_s0 + $0x18] sm:$0xff]   ;;  %v445_v12 = vld [vmem:[%s550_s2] ss:$0 sm:$0xff] }
   0x5   :  { %341 = vmatprep.mubr.msk.bf16.mxu0 %vm94_vm0, %v368_v3  ;;  %349 = vmatprep.mubr.msk.bf16.mxu1 %vm94_vm0, %v369_v4  ;;  %v375_v11 = vld [vmem:[%s549_s0 + $0x38] sm:$0xff]   ;;  %v450_v14 = vld [vmem:[%s551_s3] ss:$0 sm:$0xff] }
   0x7   :  { %338 = vmatpush3.bf16.msra.mxu0 %v366_v1  ;;  %361 = vmatpush3.bf16.msra.mxu1 %v366_v1 }
   0x8   :  { %363 = vmatprep.subr.msk.bf16.mxu0 %vm119_vm1, %v367_v2  ;;  %364 = vmatprep.subr.msk.bf16.mxu1 %vm119_vm1, %v367_v2 }
   0xb   :  { %340 = vmatpush3.bf16.msra.mxu0 %v121_v5  ;;  %362 = vmatpush3.bf16.msra.mxu1 %v121_v5 }
   0xe   :  { %342 = vmatmul.mubr.msk.bf16.vlgmr.msra.gmra.mrb[0].mxu0 %vm94_vm0, %v370_v6  ;;  %350 = vmatmul.mubr.msk.bf16.vlgmr.msra.gmra.mrb[0].mxu1 %vm94_vm0, %v371_v7 }
   0xf   :  { %345 = vmatprep.mubr.msk.bf16.mxu0 %vm94_vm0, %v372_v8  ;;  %353 = vmatprep.mubr.msk.bf16.mxu1 %vm94_vm0, %v373_v9 }
  0x16   :  { %346 = vmatmul.mubr.msk.bf16.gmra.mrb[4].mxu0 %vm94_vm0, %v374_v10  ;;  %354 = vmatmul.mubr.msk.bf16.gmra.mrb[4].mxu1 %vm94_vm0, %v375_v11 }
  0xe1   :  { %v343_v13 = vpop.f32.mrb[0].mxu0  ;;  %v351_v15 = vpop.f32.mrb[0].mxu1 }
  0xe2   :  { %v229_v16 = vmul.f32 %v343_v13, %v445_v12  ;;  %v237_v17 = vmul.f32 %v351_v15, %v445_v12  ;;  %v157_v18 = vpop.f32.mrb[1].mxu0  ;;  %v189_v19 = vpop.f32.mrb[1].mxu1 }
  0xe3   :  { %v227_v20 = vmul.f32 %v445_v12, %v157_v18  ;;  %v235_v21 = vmul.f32 %v445_v12, %v189_v19  ;;  %v344_v22 = vpop.f32.mrb[2].mxu0  ;;  %v352_v23 = vpop.f32.mrb[2].mxu1 }
  0xe4   :  { %v252_v24 = vadd.f32 %v450_v14, %v229_v16  ;;  %v260_v25 = vadd.f32 %v450_v14, %v237_v17  ;;  %v230_v26 = vmul.f32 %v344_v22, %v445_v12  ;;  %v238_v27 = vmul.f32 %v352_v23, %v445_v12  ;;  %v160_v28 = vpop.f32.mrb[3].mxu0  ;;  %v192_v29 = vpop.f32.mrb[3].mxu1 }
  0xe5   :  { %v250_v30 = vadd.f32 %v450_v14, %v227_v20  ;;  %v258_v31 = vadd.f32 %v450_v14, %v235_v21  ;;  %v228_v32 = vmul.f32 %v445_v12, %v160_v28  ;;  %v236_v33 = vmul.f32 %v445_v12, %v192_v29 }
  0xe6   :  { %v268_v34 = vmax.f32 %v252_v24, 0.0  ;;  %v276_v35 = vmax.f32 %v260_v25, 0.0  ;;  %v253_v36 = vadd.f32 %v450_v14, %v230_v26  ;;  %v261_v37 = vadd.f32 %v450_v14, %v238_v27 }
  0xe7   :  { %v266_v38 = vmax.f32 %v250_v30, 0.0  ;;  %v274_v39 = vmax.f32 %v258_v31, 0.0  ;;  %v251_v40 = vadd.f32 %v450_v14, %v228_v32  ;;  %v259_v41 = vadd.f32 %v450_v14, %v236_v33 }
  0xe8   :  { %285 = vst.msk [vmem:[%s552_s4 + $0x10] sm:$0xff] %vm282_vm2, %v268_v34  ;;  %293 = vst.msk [vmem:[%s552_s4 + $0x50] sm:$0xff] %vm282_vm2, %v276_v35  ;;  %v269_v42 = vmax.f32 %v253_v36, 0.0  ;;  %v277_v43 = vmax.f32 %v261_v37, 0.0 }
  0xe9   :  { %283 = vst.msk [vmem:[%s552_s4] sm:$0xff] %vm282_vm2, %v266_v38  ;;  %291 = vst.msk [vmem:[%s552_s4 + $0x40] sm:$0xff] %vm282_vm2, %v274_v39  ;;  %v267_v44 = vmax.f32 %v251_v40, 0.0  ;;  %v275_v45 = vmax.f32 %v259_v41, 0.0  ;;  %v347_v46 = vpop.f32.mrb[4].mxu0  ;;  %v355_v47 = vpop.f32.mrb[4].mxu1 }
  0xea   :  { %286 = vst.msk [vmem:[%s552_s4 + $0x18] sm:$0xff] %vm282_vm2, %v269_v42  ;;  %294 = vst.msk [vmem:[%s552_s4 + $0x58] sm:$0xff] %vm282_vm2, %v277_v43  ;;  %v233_v48 = vmul.f32 %v347_v46, %v445_v12  ;;  %v241_v49 = vmul.f32 %v355_v47, %v445_v12  ;;  %v173_v50 = vpop.f32.mrb[5].mxu0  ;;  %v205_v51 = vpop.f32.mrb[5].mxu1 }
  0xeb   :  { %284 = vst.msk [vmem:[%s552_s4 + $0x8] sm:$0xff] %vm282_vm2, %v267_v44  ;;  %292 = vst.msk [vmem:[%s552_s4 + $0x48] sm:$0xff] %vm282_vm2, %v275_v45  ;;  %v231_v52 = vmul.f32 %v445_v12, %v173_v50  ;;  %v239_v53 = vmul.f32 %v445_v12, %v205_v51  ;;  %v348_v54 = vpop.f32.mrb[6].mxu0  ;;  %v356_v55 = vpop.f32.mrb[6].mxu1 }
  0xec   :  { %v256_v56 = vadd.f32 %v450_v14, %v233_v48  ;;  %v264_v57 = vadd.f32 %v450_v14, %v241_v49  ;;  %v234_v58 = vmul.f32 %v348_v54, %v445_v12  ;;  %v242_v59 = vmul.f32 %v356_v55, %v445_v12  ;;  %v176_v60 = vpop.f32.mrb[7].mxu0  ;;  %v208_v61 = vpop.f32.mrb[7].mxu1 }
  0xed   :  { %v254_v62 = vadd.f32 %v450_v14, %v231_v52  ;;  %v262_v63 = vadd.f32 %v450_v14, %v239_v53  ;;  %v232_v0 = vmul.f32 %v445_v12, %v176_v60  ;;  %v240_v1 = vmul.f32 %v445_v12, %v208_v61 }
  0xee   :  { %v272_v2 = vmax.f32 %v256_v56, 0.0  ;;  %v280_v3 = vmax.f32 %v264_v57, 0.0  ;;  %v257_v4 = vadd.f32 %v450_v14, %v234_v58  ;;  %v265_v5 = vadd.f32 %v450_v14, %v242_v59 }
  0xef   :  { %v270_v6 = vmax.f32 %v254_v62, 0.0  ;;  %v278_v7 = vmax.f32 %v262_v63, 0.0  ;;  %v255_v8 = vadd.f32 %v450_v14, %v232_v0  ;;  %v263_v9 = vadd.f32 %v450_v14, %v240_v1 }
  0xf0   :  { %289 = vst.msk [vmem:[%s552_s4 + $0x30] sm:$0xff] %vm282_vm2, %v272_v2  ;;  %297 = vst.msk [vmem:[%s552_s4 + $0x70] sm:$0xff] %vm282_vm2, %v280_v3  ;;  %v273_v10 = vmax.f32 %v257_v4, 0.0  ;;  %v281_v11 = vmax.f32 %v265_v5, 0.0 }
  0xf1   :  { %287 = vst.msk [vmem:[%s552_s4 + $0x20] sm:$0xff] %vm282_vm2, %v270_v6  ;;  %295 = vst.msk [vmem:[%s552_s4 + $0x60] sm:$0xff] %vm282_vm2, %v278_v7  ;;  %v271_v12 = vmax.f32 %v255_v8, 0.0  ;;  %v279_v13 = vmax.f32 %v263_v9, 0.0 }
  0xf2   :  { %290 = vst.msk [vmem:[%s552_s4 + $0x38] sm:$0xff] %vm282_vm2, %v273_v10  ;;  %298 = vst.msk [vmem:[%s552_s4 + $0x78] sm:$0xff] %vm282_vm2, %v281_v11 }
  0xf3   :  { %288 = vst.msk [vmem:[%s552_s4 + $0x28] sm:$0xff] %vm282_vm2, %v271_v12  ;;  %296 = vst.msk [vmem:[%s552_s4 + $0x68] sm:$0xff] %vm282_vm2, %v279_v13 }

// kernel: _basic_block_forward.4
= control target key start
LH: loop header
LB: loop body
LE: loop exit
PB: predicated region body
PF: predicated region fallthrough
CT: control target
= control target key end

     0   :  { %vm100_vm0 = vcmask 1041408   ;;  %vm75_vm1 = vcmask 31744   ;;  %vm247_vm2 = vcmask 64512   ;;  %s455_s1 = inlined_call_operand.vmem [shape: bf16[4,8], index: 1, kind: input, shape index: {}]   ;;  %s456_s0 = inlined_call_operand.vmem [shape: bf16[128,4], index: 0, kind: input, shape index: {}]   ;;  %s457_s2 = inlined_call_operand.vmem [shape: f32[1,8], index: 2, kind: input, shape index: {}]   ;;  %s458_s3 = inlined_call_operand.vmem [shape: f32[1,8], index: 3, kind: input, shape index: {}]   ;;  %s459_s4 = inlined_call_operand.vmem [shape: f32[128,8], index: 4, kind: output, shape index: {}]  }
   0x1   :  { %v34_v0 = vld [vmem:[%s455_s1] sm:$0x3]  ;;  %v319_v4 = vld [vmem:[%s456_s0 + $0x8] sm:$0xff]   ;;  %v321_v6 = vld [vmem:[%s456_s0 + $0x10] sm:$0xff]  }
   0x2   :  { %315 = vmatprep.subr.msk.bf16.mxu0 %vm100_vm0, %v34_v0  ;;  %316 = vmatprep.subr.msk.bf16.mxu1 %vm100_vm0, %v34_v0  ;;  %v102_v1 = vsel %vm100_vm0, %v34_v0, 0  ;;  %v317_v2 = vld [vmem:[%s456_s0] sm:$0xff]   ;;  %v320_v5 = vld [vmem:[%s456_s0 + $0x28] sm:$0xff]   ;;  %v322_v7 = vld [vmem:[%s456_s0 + $0x30] sm:$0xff]  }
   0x3   :  { %296 = vmatpush3.bf16.msra.mxu0 %v102_v1  ;;  %314 = vmatpush3.bf16.msra.mxu1 %v102_v1  ;;  %v318_v3 = vld [vmem:[%s456_s0 + $0x20] sm:$0xff]   ;;  %v323_v8 = vld [vmem:[%s456_s0 + $0x18] sm:$0xff]  }
   0x4   :  { %297 = vmatprep.mubr.msk.bf16.mxu0 %vm75_vm1, %v317_v2  ;;  %305 = vmatprep.mubr.msk.bf16.mxu1 %vm75_vm1, %v318_v3  ;;  %v324_v9 = vld [vmem:[%s456_s0 + $0x38] sm:$0xff]   ;;  %v284_v10 = vld [vmem:[%s457_s2] ss:$0 sm:$0xff] }
   0x5   :  { %v285_v12 = vld [vmem:[%s458_s3] ss:$0 sm:$0xff] }
   0x6   :  { %298 = vmatmul.mubr.msk.bf16.vlgmr.msra.gmra.mrb[0].mxu0 %vm75_vm1, %v319_v4  ;;  %306 = vmatmul.mubr.msk.bf16.vlgmr.msra.gmra.mrb[0].mxu1 %vm75_vm1, %v320_v5 }
   0x7   :  { %301 = vmatprep.mubr.msk.bf16.mxu0 %vm75_vm1, %v321_v6  ;;  %309 = vmatprep.mubr.msk.bf16.mxu1 %vm75_vm1, %v322_v7 }
   0xe   :  { %302 = vmatmul.mubr.msk.bf16.gmra.mrb[4].mxu0 %vm75_vm1, %v323_v8  ;;  %310 = vmatmul.mubr.msk.bf16.gmra.mrb[4].mxu1 %vm75_vm1, %v324_v9 }
  0xd9   :  { %v299_v11 = vpop.f32.mrb[0].mxu0  ;;  %v307_v14 = vpop.f32.mrb[0].mxu1 }
  0xda   :  { %v210_v13 = vmul.f32 %v299_v11, %v284_v10  ;;  %v138_v15 = vpop.f32.mrb[1].mxu0  ;;  %v218_v16 = vmul.f32 %v307_v14, %v284_v10  ;;  %v170_v18 = vpop.f32.mrb[1].mxu1 }
  0xdb   :  { %v208_v17 = vmul.f32 %v284_v10, %v138_v15  ;;  %v300_v19 = vpop.f32.mrb[2].mxu0  ;;  %v216_v21 = vmul.f32 %v284_v10, %v170_v18  ;;  %v308_v23 = vpop.f32.mrb[2].mxu1 }
  0xdc   :  { %v233_v20 = vadd.f32 %v285_v12, %v210_v13  ;;  %v211_v22 = vmul.f32 %v300_v19, %v284_v10  ;;  %v141_v24 = vpop.f32.mrb[3].mxu0  ;;  %v241_v25 = vadd.f32 %v285_v12, %v218_v16  ;;  %v219_v27 = vmul.f32 %v308_v23, %v284_v10  ;;  %v173_v29 = vpop.f32.mrb[3].mxu1 }
  0xdd   :  { %v231_v26 = vadd.f32 %v285_v12, %v208_v17  ;;  %v209_v28 = vmul.f32 %v284_v10, %v141_v24  ;;  %v239_v30 = vadd.f32 %v285_v12, %v216_v21  ;;  %v217_v32 = vmul.f32 %v284_v10, %v173_v29 }
  0xde   :  { %250 = vst.msk [vmem:[%s459_s4 + $0x10] sm:$0xff] %vm247_vm2, %v233_v20  ;;  %v234_v31 = vadd.f32 %v285_v12, %v211_v22  ;;  %258 = vst.msk [vmem:[%s459_s4 + $0x50] sm:$0xff] %vm247_vm2, %v241_v25  ;;  %v242_v33 = vadd.f32 %v285_v12, %v219_v27 }
  0xdf   :  { %248 = vst.msk [vmem:[%s459_s4] sm:$0xff] %vm247_vm2, %v231_v26  ;;  %v232_v34 = vadd.f32 %v285_v12, %v209_v28  ;;  %256 = vst.msk [vmem:[%s459_s4 + $0x40] sm:$0xff] %vm247_vm2, %v239_v30  ;;  %v240_v35 = vadd.f32 %v285_v12, %v217_v32 }
  0xe0   :  { %251 = vst.msk [vmem:[%s459_s4 + $0x18] sm:$0xff] %vm247_vm2, %v234_v31  ;;  %259 = vst.msk [vmem:[%s459_s4 + $0x58] sm:$0xff] %vm247_vm2, %v242_v33 }
  0xe1   :  { %249 = vst.msk [vmem:[%s459_s4 + $0x8] sm:$0xff] %vm247_vm2, %v232_v34  ;;  %v303_v36 = vpop.f32.mrb[4].mxu0  ;;  %257 = vst.msk [vmem:[%s459_s4 + $0x48] sm:$0xff] %vm247_vm2, %v240_v35  ;;  %v311_v38 = vpop.f32.mrb[4].mxu1 }
  0xe2   :  { %v214_v37 = vmul.f32 %v303_v36, %v284_v10  ;;  %v154_v39 = vpop.f32.mrb[5].mxu0  ;;  %v222_v40 = vmul.f32 %v311_v38, %v284_v10  ;;  %v186_v42 = vpop.f32.mrb[5].mxu1 }
  0xe3   :  { %v212_v41 = vmul.f32 %v284_v10, %v154_v39  ;;  %v304_v43 = vpop.f32.mrb[6].mxu0  ;;  %v220_v45 = vmul.f32 %v284_v10, %v186_v42  ;;  %v312_v47 = vpop.f32.mrb[6].mxu1 }
  0xe4   :  { %v237_v44 = vadd.f32 %v285_v12, %v214_v37  ;;  %v215_v46 = vmul.f32 %v304_v43, %v284_v10  ;;  %v157_v48 = vpop.f32.mrb[7].mxu0  ;;  %v245_v49 = vadd.f32 %v285_v12, %v222_v40  ;;  %v223_v51 = vmul.f32 %v312_v47, %v284_v10  ;;  %v189_v53 = vpop.f32.mrb[7].mxu1 }
  0xe5   :  { %v235_v50 = vadd.f32 %v285_v12, %v212_v41  ;;  %v213_v52 = vmul.f32 %v284_v10, %v157_v48  ;;  %v243_v54 = vadd.f32 %v285_v12, %v220_v45  ;;  %v221_v56 = vmul.f32 %v284_v10, %v189_v53 }
  0xe6   :  { %254 = vst.msk [vmem:[%s459_s4 + $0x30] sm:$0xff] %vm247_vm2, %v237_v44  ;;  %v238_v55 = vadd.f32 %v285_v12, %v215_v46  ;;  %262 = vst.msk [vmem:[%s459_s4 + $0x70] sm:$0xff] %vm247_vm2, %v245_v49  ;;  %v246_v57 = vadd.f32 %v285_v12, %v223_v51 }
  0xe7   :  { %252 = vst.msk [vmem:[%s459_s4 + $0x20] sm:$0xff] %vm247_vm2, %v235_v50  ;;  %v236_v58 = vadd.f32 %v285_v12, %v213_v52  ;;  %260 = vst.msk [vmem:[%s459_s4 + $0x60] sm:$0xff] %vm247_vm2, %v243_v54  ;;  %v244_v59 = vadd.f32 %v285_v12, %v221_v56 }
  0xe8   :  { %255 = vst.msk [vmem:[%s459_s4 + $0x38] sm:$0xff] %vm247_vm2, %v238_v55  ;;  %263 = vst.msk [vmem:[%s459_s4 + $0x78] sm:$0xff] %vm247_vm2, %v246_v57 }
  0xe9   :  { %253 = vst.msk [vmem:[%s459_s4 + $0x28] sm:$0xff] %vm247_vm2, %v236_v58  ;;  %261 = vst.msk [vmem:[%s459_s4 + $0x68] sm:$0xff] %vm247_vm2, %v244_v59 }

// kernel: _basic_block_forward.5
= control target key start
LH: loop header
LB: loop body
LE: loop exit
PB: predicated region body
PF: predicated region fallthrough
CT: control target
= control target key end

     0   :  { %vm113_vm0 = vcmask 588800   ;;  %vm138_vm1 = vcmask 1043456   ;;  %vm333_vm2 = vcmask 64512   ;;  %s672_s1 = inlined_call_operand.vmem [shape: bf16[72,8], index: 1, kind: input, shape index: {}]   ;;  %s673_s0 = inlined_call_operand.vmem [shape: bf16[128,72], index: 0, kind: input, shape index: {}]   ;;  %s674_s2 = inlined_call_operand.vmem [shape: f32[1,8], index: 2, kind: input, shape index: {}]   ;;  %s675_s3 = inlined_call_operand.vmem [shape: f32[1,8], index: 3, kind: input, shape index: {}]   ;;  %s676_s4 = inlined_call_operand.vmem [shape: f32[128,8], index: 4, kind: input, shape index: {}]   ;;  %s677_s5 = inlined_call_operand.vmem [shape: f32[128,8], index: 5, kind: output, shape index: {}]  }
   0x1   :  { %v428_v0 = vld [vmem:[%s672_s1] sm:$0xff]   ;;  %v429_v1 = vld [vmem:[%s672_s1 + $0x8] sm:$0xff]   ;;  %v430_v2 = vld [vmem:[%s672_s1 + $0x10] sm:$0xff]  }
   0x2   :  { %390 = vmatprep.subr.bf16.mxu0 %v428_v0  ;;  %416 = vmatprep.subr.bf16.mxu1 %v428_v0  ;;  %v433_v3 = vld [vmem:[%s673_s0] sm:$0xff]   ;;  %v431_v5 = vld [vmem:[%s672_s1 + $0x18] sm:$0xff]   ;;  %v435_v8 = vld [vmem:[%s673_s0 + $0x8] sm:$0xff]  }
   0x3   :  { %391 = vmatpush3.bf16.msra.mxu0 %v428_v0  ;;  %421 = vmatpush3.bf16.msra.mxu1 %v428_v0  ;;  %v434_v4 = vld [vmem:[%s673_s0 + $0x20] sm:$0xff]   ;;  %v436_v9 = vld [vmem:[%s673_s0 + $0x28] sm:$0xff]   ;;  %v437_v10 = vld [vmem:[%s673_s0 + $0x10] sm:$0xff]  }
   0x4   :  { %392 = vmatprep.subr.bf16.mxu0 %v429_v1  ;;  %417 = vmatprep.subr.bf16.mxu1 %v429_v1  ;;  %v432_v6 = vld [vmem:[%s672_s1 + $0x20] ss:$0 sps:$4 sm:$0xff]   ;;  %v438_v11 = vld [vmem:[%s673_s0 + $0x30] sm:$0xff]   ;;  %v439_v12 = vld [vmem:[%s673_s0 + $0x18] sm:$0xff]  }
   0x5   :  { %400 = vmatprep.mubr.msk.bf16.mxu0 %vm113_vm0, %v433_v3  ;;  %408 = vmatprep.mubr.msk.bf16.mxu1 %vm113_vm0, %v434_v4  ;;  %v140_v7 = vsel %vm138_vm1, %v432_v6, 0  ;;  %v440_v13 = vld [vmem:[%s673_s0 + $0x38] sm:$0xff]   ;;  %v521_v14 = vld [vmem:[%s674_s2] ss:$0 sm:$0xff]  ;;  %v287_v22 = vld [vmem:[%s676_s4 + $0x10] sm:$0xff] }
   0x6   :  { %v526_v16 = vld [vmem:[%s675_s3] ss:$0 sm:$0xff]  ;;  %v295_v23 = vld [vmem:[%s676_s4 + $0x50] sm:$0xff]  ;;  %v288_v38 = vld [vmem:[%s676_s4 + $0x18] sm:$0xff] }
   0x7   :  { %393 = vmatpush3.bf16.msra.mxu0 %v429_v1  ;;  %422 = vmatpush3.bf16.msra.mxu1 %v429_v1  ;;  %v285_v30 = vld [vmem:[%s676_s4] sm:$0xff]  ;;  %v296_v39 = vld [vmem:[%s676_s4 + $0x58] sm:$0xff]  ;;  %v286_v46 = vld [vmem:[%s676_s4 + $0x8] sm:$0xff] }
   0x8   :  { %394 = vmatprep.subr.bf16.mxu0 %v430_v2  ;;  %418 = vmatprep.subr.bf16.mxu1 %v430_v2  ;;  %v293_v31 = vld [vmem:[%s676_s4 + $0x40] sm:$0xff]  ;;  %v294_v47 = vld [vmem:[%s676_s4 + $0x48] sm:$0xff] }
   0xb   :  { %395 = vmatpush3.bf16.msra.mxu0 %v430_v2  ;;  %423 = vmatpush3.bf16.msra.mxu1 %v430_v2 }
   0xc   :  { %396 = vmatprep.subr.bf16.mxu0 %v431_v5  ;;  %419 = vmatprep.subr.bf16.mxu1 %v431_v5 }
   0xf   :  { %397 = vmatpush3.bf16.msra.mxu0 %v431_v5  ;;  %424 = vmatpush3.bf16.msra.mxu1 %v431_v5 }
  0x10   :  { %426 = vmatprep.subr.msk.bf16.mxu0 %vm138_vm1, %v432_v6  ;;  %427 = vmatprep.subr.msk.bf16.mxu1 %vm138_vm1, %v432_v6  ;;  %v291_v6 = vld [vmem:[%s676_s4 + $0x30] sm:$0xff] }
  0x13   :  { %399 = vmatpush3.bf16.msra.mxu0 %v140_v7  ;;  %425 = vmatpush3.bf16.msra.mxu1 %v140_v7  ;;  %v299_v7 = vld [vmem:[%s676_s4 + $0x70] sm:$0xff] }
  0x16   :  { %401 = vmatmul.mubr.msk.bf16.vlgmr.msra.gmra.mrb[0].mxu0 %vm113_vm0, %v435_v8  ;;  %409 = vmatmul.mubr.msk.bf16.vlgmr.msra.gmra.mrb[0].mxu1 %vm113_vm0, %v436_v9 }
  0x17   :  { %404 = vmatprep.mubr.msk.bf16.mxu0 %vm113_vm0, %v437_v10  ;;  %412 = vmatprep.mubr.msk.bf16.mxu1 %vm113_vm0, %v438_v11 }
  0x1e   :  { %405 = vmatmul.mubr.msk.bf16.gmra.mrb[4].mxu0 %vm113_vm0, %v439_v12  ;;  %413 = vmatmul.mubr.msk.bf16.gmra.mrb[4].mxu1 %vm113_vm0, %v440_v13 }
  0xe9   :  { %v402_v15 = vpop.f32.mrb[0].mxu0  ;;  %v410_v17 = vpop.f32.mrb[0].mxu1 }
  0xea   :  { %v248_v18 = vmul.f32 %v402_v15, %v521_v14  ;;  %v256_v19 = vmul.f32 %v410_v17, %v521_v14  ;;  %v176_v20 = vpop.f32.mrb[1].mxu0  ;;  %v208_v21 = vpop.f32.mrb[1].mxu1  ;;  %v289_v15 = vld [vmem:[%s676_s4 + $0x20] sm:$0xff] }
  0xeb   :  { %v246_v24 = vmul.f32 %v521_v14, %v176_v20  ;;  %v254_v25 = vmul.f32 %v521_v14, %v208_v21  ;;  %v403_v26 = vpop.f32.mrb[2].mxu0  ;;  %v411_v27 = vpop.f32.mrb[2].mxu1  ;;  %v297_v17 = vld [vmem:[%s676_s4 + $0x60] sm:$0xff] }
  0xec   :  { %v271_v28 = vadd.f32 %v526_v16, %v248_v18  ;;  %v279_v29 = vadd.f32 %v526_v16, %v256_v19  ;;  %v249_v32 = vmul.f32 %v403_v26, %v521_v14  ;;  %v257_v33 = vmul.f32 %v411_v27, %v521_v14  ;;  %v179_v34 = vpop.f32.mrb[3].mxu0  ;;  %v211_v35 = vpop.f32.mrb[3].mxu1 }
  0xed   :  { %v269_v36 = vadd.f32 %v526_v16, %v246_v24  ;;  %v277_v37 = vadd.f32 %v526_v16, %v254_v25  ;;  %v247_v40 = vmul.f32 %v521_v14, %v179_v34  ;;  %v255_v41 = vmul.f32 %v521_v14, %v211_v35  ;;  %v292_v24 = vld [vmem:[%s676_s4 + $0x38] sm:$0xff] }
  0xee   :  { %v303_v42 = vadd.f32 %v287_v22, %v271_v28  ;;  %v311_v43 = vadd.f32 %v295_v23, %v279_v29  ;;  %v272_v44 = vadd.f32 %v526_v16, %v249_v32  ;;  %v280_v45 = vadd.f32 %v526_v16, %v257_v33  ;;  %v300_v25 = vld [vmem:[%s676_s4 + $0x78] sm:$0xff]  ;;  %v290_v32 = vld [vmem:[%s676_s4 + $0x28] sm:$0xff] }
  0xef   :  { %v301_v48 = vadd.f32 %v285_v30, %v269_v36  ;;  %v309_v49 = vadd.f32 %v293_v31, %v277_v37  ;;  %v270_v50 = vadd.f32 %v526_v16, %v247_v40  ;;  %v278_v51 = vadd.f32 %v526_v16, %v255_v41  ;;  %v298_v33 = vld [vmem:[%s676_s4 + $0x68] sm:$0xff] }
  0xf0   :  { %v319_v52 = vmax.f32 %v303_v42, 0.0  ;;  %v327_v53 = vmax.f32 %v311_v43, 0.0  ;;  %v304_v54 = vadd.f32 %v288_v38, %v272_v44  ;;  %v312_v55 = vadd.f32 %v296_v39, %v280_v45 }
  0xf1   :  { %v317_v56 = vmax.f32 %v301_v48, 0.0  ;;  %v325_v57 = vmax.f32 %v309_v49, 0.0  ;;  %v302_v58 = vadd.f32 %v286_v46, %v270_v50  ;;  %v310_v59 = vadd.f32 %v294_v47, %v278_v51  ;;  %v406_v60 = vpop.f32.mrb[4].mxu0  ;;  %v414_v61 = vpop.f32.mrb[4].mxu1 }
  0xf2   :  { %336 = vst.msk [vmem:[%s677_s5 + $0x10] sm:$0xff] %vm333_vm2, %v319_v52  ;;  %344 = vst.msk [vmem:[%s677_s5 + $0x50] sm:$0xff] %vm333_vm2, %v327_v53  ;;  %v320_v62 = vmax.f32 %v304_v54, 0.0  ;;  %v328_v63 = vmax.f32 %v312_v55, 0.0  ;;  %v252_v0 = vmul.f32 %v406_v60, %v521_v14  ;;  %v260_v1 = vmul.f32 %v414_v61, %v521_v14  ;;  %v192_v2 = vpop.f32.mrb[5].mxu0  ;;  %v224_v3 = vpop.f32.mrb[5].mxu1 }
  0xf3   :  { %334 = vst.msk [vmem:[%s677_s5] sm:$0xff] %vm333_vm2, %v317_v56  ;;  %342 = vst.msk [vmem:[%s677_s5 + $0x40] sm:$0xff] %vm333_vm2, %v325_v57  ;;  %v318_v4 = vmax.f32 %v302_v58, 0.0  ;;  %v326_v5 = vmax.f32 %v310_v59, 0.0  ;;  %v250_v8 = vmul.f32 %v521_v14, %v192_v2  ;;  %v258_v9 = vmul.f32 %v521_v14, %v224_v3  ;;  %v407_v10 = vpop.f32.mrb[6].mxu0  ;;  %v415_v11 = vpop.f32.mrb[6].mxu1 }
  0xf4   :  { %337 = vst.msk [vmem:[%s677_s5 + $0x18] sm:$0xff] %vm333_vm2, %v320_v62  ;;  %345 = vst.msk [vmem:[%s677_s5 + $0x58] sm:$0xff] %vm333_vm2, %v328_v63  ;;  %v275_v12 = vadd.f32 %v526_v16, %v252_v0  ;;  %v283_v13 = vadd.f32 %v526_v16, %v260_v1  ;;  %v253_v18 = vmul.f32 %v407_v10, %v521_v14  ;;  %v195_v20 = vpop.f32.mrb[7].mxu0  ;;  %v227_v21 = vpop.f32.mrb[7].mxu1 }
  0xf5   :  { %v261_v19 = vmul.f32 %v415_v11, %v521_v14  ;;  %335 = vst.msk [vmem:[%s677_s5 + $0x8] sm:$0xff] %vm333_vm2, %v318_v4  ;;  %343 = vst.msk [vmem:[%s677_s5 + $0x48] sm:$0xff] %vm333_vm2, %v326_v5  ;;  %v273_v22 = vadd.f32 %v526_v16, %v250_v8  ;;  %v281_v23 = vadd.f32 %v526_v16, %v258_v9 }
  0xf6   :  { %v251_v26 = vmul.f32 %v521_v14, %v195_v20  ;;  %v259_v27 = vmul.f32 %v521_v14, %v227_v21  ;;  %v307_v28 = vadd.f32 %v291_v6, %v275_v12  ;;  %v315_v29 = vadd.f32 %v299_v7, %v283_v13 }
  0xf7   :  { %v276_v30 = vadd.f32 %v526_v16, %v253_v18  ;;  %v284_v31 = vadd.f32 %v526_v16, %v261_v19  ;;  %v305_v34 = vadd.f32 %v289_v15, %v273_v22  ;;  %v313_v35 = vadd.f32 %v297_v17, %v281_v23 }
  0xf8   :  { %v274_v36 = vadd.f32 %v526_v16, %v251_v26  ;;  %v282_v14 = vadd.f32 %v526_v16, %v259_v27  ;;  %v323_v37 = vmax.f32 %v307_v28, 0.0  ;;  %v331_v38 = vmax.f32 %v315_v29, 0.0 }
  0xf9   :  { %v308_v39 = vadd.f32 %v292_v24, %v276_v30  ;;  %v316_v40 = vadd.f32 %v300_v25, %v284_v31  ;;  %v321_v41 = vmax.f32 %v305_v34, 0.0  ;;  %v329_v42 = vmax.f32 %v313_v35, 0.0 }
  0xfa   :  { %v306_v43 = vadd.f32 %v290_v32, %v274_v36  ;;  %v314_v44 = vadd.f32 %v298_v33, %v282_v14  ;;  %340 = vst.msk [vmem:[%s677_s5 + $0x30] sm:$0xff] %vm333_vm2, %v323_v37  ;;  %348 = vst.msk [vmem:[%s677_s5 + $0x70] sm:$0xff] %vm333_vm2, %v331_v38 }
  0xfb   :  { %v324_v45 = vmax.f32 %v308_v39, 0.0  ;;  %v332_v16 = vmax.f32 %v316_v40, 0.0  ;;  %338 = vst.msk [vmem:[%s677_s5 + $0x20] sm:$0xff] %vm333_vm2, %v321_v41  ;;  %346 = vst.msk [vmem:[%s677_s5 + $0x60] sm:$0xff] %vm333_vm2, %v329_v42 }
  0xfc   :  { %v322_v46 = vmax.f32 %v306_v43, 0.0  ;;  %v330_v47 = vmax.f32 %v314_v44, 0.0 }
  0xfd   :  { %341 = vst.msk [vmem:[%s677_s5 + $0x38] sm:$0xff] %vm333_vm2, %v324_v45  ;;  %349 = vst.msk [vmem:[%s677_s5 + $0x78] sm:$0xff] %vm333_vm2, %v332_v16 }
  0xfe   :  { %339 = vst.msk [vmem:[%s677_s5 + $0x28] sm:$0xff] %vm333_vm2, %v322_v46  ;;  %347 = vst.msk [vmem:[%s677_s5 + $0x68] sm:$0xff] %vm333_vm2, %v330_v47 }

</bundles_post_ra>
